<compile_context>
chip_gen: v7x
topology: tpu7x:2x2x1
jax: 0.10.0
libtpu: 0.0.40
codegen_flags: <defaults>
</compile_context>

<pallas_src>
import functools

import jax
import jax.numpy as jnp
from jax.experimental import pallas as pl
from jax.experimental.pallas import tpu as pltpu

_NEG_LARGE = -1e30  # finite "minus infinity" for masked maxima


def _action_smoothing_kernel(cur_ref, prev_ref, out_ref, *, nvec, apply_log_softmax):
    # cur: [1, A] current-action (logits or log-probs), prev: [W, A].
    cur = cur_ref[...].astype(jnp.float32)
    prev = prev_ref[...].astype(jnp.float32)
    A = cur.shape[1]
    W = prev.shape[0]

    lane = jax.lax.broadcasted_iota(jnp.int32, (1, A), 1)  # [1, A] lane index

    # Per-segment lane masks + fused (1/nvec[j])*(1/W) weight row, built
    # in-kernel from the static nvec (no extra inputs, no DMAs; VPU is idle).
    masks = []
    w = jnp.zeros((1, A), jnp.float32)
    offset = 0
    for n in nvec:
        m = jnp.logical_and(lane >= offset, lane < offset + n)  # [1, A] bool
        masks.append(m)
        w = w + jnp.where(m, 1.0 / (float(n) * float(W)), 0.0)
        offset += n

    def seg_log_softmax(x, need_probs):
        """Per-segment log_softmax (lane axis) + optionally softmax probs."""
        if not apply_log_softmax:
            # Inputs are already per-segment log-probabilities.
            probs = jnp.exp(x) if need_probs else None
            return x, probs

        # Segment max: additive merge of disjoint masked terms (no select chain).
        m_b = jnp.zeros_like(x)
        for m in masks:
            seg_max = jnp.max(jnp.where(m, x, _NEG_LARGE), axis=1, keepdims=True)
            m_b = m_b + jnp.where(m, seg_max, 0.0)

        shifted = x - m_b
        ep = jnp.exp(shifted)  # one EUP exp pass per operand

        # Segmented sum of exp: masked XLU reductions, additive merge.
        # (Replaces the former bf16 MXU matmul -> exact f32 normalizer.)
        sum_b = jnp.zeros_like(x)
        for m in masks:
            seg_sum = jnp.sum(jnp.where(m, ep, 0.0), axis=1, keepdims=True)
            sum_b = sum_b + jnp.where(m, seg_sum, 0.0)

        log_sm = shifted - jnp.log(sum_b)

        if need_probs:
            inv = pl.reciprocal(sum_b, approx=True)   # EUP reciprocal
            inv = inv * (2.0 - sum_b * inv)           # one Newton step (VPU idle)
            probs = ep * inv                          # softmax probs, no 2nd exp
        else:
            probs = None
        return log_sm, probs

    c_log, _ = seg_log_softmax(cur, need_probs=False)      # [1, A]
    p_log, p_sm = seg_log_softmax(prev, need_probs=True)   # [W, A]

    # KLDiv(log_target=True): exp(p) * (p - c); batchmean (1/nvec) and 1/W are
    # folded into w -> one fused weighted reduction to the (1,1) output.
    kl = p_sm * (p_log - c_log)                             # [W, A]
    out_ref[...] = jnp.sum(kl * w, keepdims=True)           # (1, 1)


@functools.partial(jax.jit, static_argnames=("nvec", "logits"))
def _action_smoothing_loss_jit(current_action, previous_actions, nvec, logits):
    A = sum(nvec)
    cur = jnp.reshape(current_action, (1, A))
    prev = jnp.reshape(previous_actions, (-1, A))

    kernel = functools.partial(
        _action_smoothing_kernel, nvec=nvec, apply_log_softmax=logits
    )
    out = pl.pallas_call(
        kernel,
        out_shape=jax.ShapeDtypeStruct((1, 1), jnp.float32),
        in_specs=[
            pl.BlockSpec(memory_space=pltpu.VMEM),   # cur:  [1, A]
            pl.BlockSpec(memory_space=pltpu.VMEM),   # prev: [W, A]
        ],
        out_specs=pl.BlockSpec(memory_space=pltpu.VMEM),
    )(cur, prev)
    return out[0, 0]


def action_smoothing_loss(current_action, previous_actions, nvec, logits=True):
    """Pallas implementation of ActionSmoothingLoss.forward."""
    nvec = tuple(int(n) for n in nvec)
    return _action_smoothing_loss_jit(
        current_action, previous_actions, nvec, bool(logits)
    )


def _reference_loss(current_action, previous_actions, nvec, logits=True):
    """Pure-JAX reference matching the PyTorch module exactly."""
    nvec = tuple(int(n) for n in nvec)
    A = sum(nvec)
    cur = jnp.reshape(current_action, (A,)).astype(jnp.float32)
    prev = jnp.reshape(previous_actions, (-1, A)).astype(jnp.float32)
    W = prev.shape[0]
    loss = 0.0
    offset = 0
    for n in nvec:
        c = cur[offset:offset + n]
        p = prev[:, offset:offset + n]
        if logits:
            c = jax.nn.log_softmax(c, axis=0)
            p = jax.nn.log_softmax(p, axis=1)
        kl = jnp.exp(p) * (p - c[None, :])
        loss = loss + jnp.sum(kl) / n
        offset += n
    return loss / W


if __name__ == "__main__":
    # Synthetic MultiDiscrete action space: nvec = (4, 6, 2, 4), A = 16, window W = 8.
    nvec = (4, 6, 2, 4)
    A = sum(nvec)
    W = 8

    key = jax.random.PRNGKey(0)
    k1, k2 = jax.random.split(key)
    current_action = jax.random.normal(k1, (A,), dtype=jnp.float32)
    previous_actions = jax.random.normal(k2, (W, A), dtype=jnp.float32)

    # logits=True path (per-segment log_softmax inside the kernel).
    loss = jax.block_until_ready(
        action_smoothing_loss(current_action, previous_actions, nvec, logits=True)
    )
    ref = jax.block_until_ready(
        _reference_loss(current_action, previous_actions, nvec, logits=True)
    )
    assert jnp.isfinite(loss), "kernel produced non-finite loss"
    assert abs(float(loss) - float(ref)) < 5e-4 * max(1.0, abs(float(ref))), (
        float(loss), float(ref))

    # logits=False path (inputs already per-segment log-probabilities).
    def _seg_log_softmax(v, axis):
        parts, off = [], 0
        for n in nvec:
            parts.append(
                jax.nn.log_softmax(jax.lax.slice_in_dim(v, off, off + n, axis=axis), axis=axis)
            )
            off += n
        return jnp.concatenate(parts, axis=axis)

    cur_lp = _seg_log_softmax(current_action, 0)
    prev_lp = _seg_log_softmax(previous_actions, 1)
    loss2 = jax.block_until_ready(
        action_smoothing_loss(cur_lp, prev_lp, nvec, logits=False)
    )
    ref2 = jax.block_until_ready(
        _reference_loss(cur_lp, prev_lp, nvec, logits=False)
    )
    assert abs(float(loss2) - float(ref2)) < 5e-4 * max(1.0, abs(float(ref2))), (
        float(loss2), float(ref2))

    print("KERNEL_OK")
</pallas_src>

<mosaic_0001>
module attributes {stable_mosaic.version = 11 : i64} {
  func.func @_action_smoothing_kernel(%arg0: memref<1x16xf32, #tpu.memory_space<vmem>>, %arg1: memref<8x16xf32, #tpu.memory_space<vmem>>, %arg2: memref<1x1xf32, #tpu.memory_space<vmem>>) attributes {dimension_semantics = [], scalar_prefetch = 0 : i64, scratch_operands = 0 : i64, tpu.core_type = #tpu.core_type<tc>} {
    %c0 = arith.constant 0 : index
    %c0_0 = arith.constant 0 : index
    %0 = vector.load %arg0[%c0, %c0_0] : memref<1x16xf32, #tpu.memory_space<vmem>>, vector<1x16xf32>
    %c0_1 = arith.constant 0 : index
    %c0_2 = arith.constant 0 : index
    %1 = vector.load %arg1[%c0_1, %c0_2] : memref<8x16xf32, #tpu.memory_space<vmem>>, vector<8x16xf32>
    %2 = tpu.iota {dimensions = array<i32: 1>} : vector<1x16xi32>
    %cst = arith.constant 0.000000e+00 : f32
    %3 = vector.broadcast %cst : f32 to vector<1x16xf32>
    %c0_i32 = arith.constant 0 : i32
    %4 = vector.broadcast %c0_i32 : i32 to vector<1x16xi32>
    %5 = arith.cmpi sge, %2, %4 : vector<1x16xi32>
    %c4_i32 = arith.constant 4 : i32
    %6 = vector.broadcast %c4_i32 : i32 to vector<1x16xi32>
    %7 = arith.cmpi slt, %2, %6 : vector<1x16xi32>
    %8 = arith.andi %5, %7 : vector<1x16xi1>
    %cst_3 = arith.constant 3.125000e-02 : f32
    %cst_4 = arith.constant 0.000000e+00 : f32
    %9 = vector.broadcast %cst_3 : f32 to vector<1x16xf32>
    %10 = vector.broadcast %cst_4 : f32 to vector<1x16xf32>
    %11 = arith.select %8, %9, %10 : vector<1x16xi1>, vector<1x16xf32>
    %12 = arith.addf %3, %11 : vector<1x16xf32>
    %c4_i32_5 = arith.constant 4 : i32
    %13 = vector.broadcast %c4_i32_5 : i32 to vector<1x16xi32>
    %14 = arith.cmpi sge, %2, %13 : vector<1x16xi32>
    %c10_i32 = arith.constant 10 : i32
    %15 = vector.broadcast %c10_i32 : i32 to vector<1x16xi32>
    %16 = arith.cmpi slt, %2, %15 : vector<1x16xi32>
    %17 = arith.andi %14, %16 : vector<1x16xi1>
    %cst_6 = arith.constant 0.020833334 : f32
    %cst_7 = arith.constant 0.000000e+00 : f32
    %18 = vector.broadcast %cst_6 : f32 to vector<1x16xf32>
    %19 = vector.broadcast %cst_7 : f32 to vector<1x16xf32>
    %20 = arith.select %17, %18, %19 : vector<1x16xi1>, vector<1x16xf32>
    %21 = arith.addf %12, %20 : vector<1x16xf32>
    %c10_i32_8 = arith.constant 10 : i32
    %22 = vector.broadcast %c10_i32_8 : i32 to vector<1x16xi32>
    %23 = arith.cmpi sge, %2, %22 : vector<1x16xi32>
    %c12_i32 = arith.constant 12 : i32
    %24 = vector.broadcast %c12_i32 : i32 to vector<1x16xi32>
    %25 = arith.cmpi slt, %2, %24 : vector<1x16xi32>
    %26 = arith.andi %23, %25 : vector<1x16xi1>
    %cst_9 = arith.constant 6.250000e-02 : f32
    %cst_10 = arith.constant 0.000000e+00 : f32
    %27 = vector.broadcast %cst_9 : f32 to vector<1x16xf32>
    %28 = vector.broadcast %cst_10 : f32 to vector<1x16xf32>
    %29 = arith.select %26, %27, %28 : vector<1x16xi1>, vector<1x16xf32>
    %30 = arith.addf %21, %29 : vector<1x16xf32>
    %c12_i32_11 = arith.constant 12 : i32
    %31 = vector.broadcast %c12_i32_11 : i32 to vector<1x16xi32>
    %32 = arith.cmpi sge, %2, %31 : vector<1x16xi32>
    %c16_i32 = arith.constant 16 : i32
    %33 = vector.broadcast %c16_i32 : i32 to vector<1x16xi32>
    %34 = arith.cmpi slt, %2, %33 : vector<1x16xi32>
    %35 = arith.andi %32, %34 : vector<1x16xi1>
    %cst_12 = arith.constant 3.125000e-02 : f32
    %cst_13 = arith.constant 0.000000e+00 : f32
    %36 = vector.broadcast %cst_12 : f32 to vector<1x16xf32>
    %37 = vector.broadcast %cst_13 : f32 to vector<1x16xf32>
    %38 = arith.select %35, %36, %37 : vector<1x16xi1>, vector<1x16xf32>
    %39 = arith.addf %30, %38 : vector<1x16xf32>
    %cst_14 = arith.constant 0.000000e+00 : f32
    %40 = vector.broadcast %cst_14 : f32 to vector<1x16xf32>
    %cst_15 = arith.constant -1.000000e+30 : f32
    %41 = vector.broadcast %cst_15 : f32 to vector<1x16xf32>
    %42 = arith.select %8, %0, %41 : vector<1x16xi1>, vector<1x16xf32>
    %cst_16 = arith.constant dense<0xFF800000> : vector<1xf32>
    %43 = vector.multi_reduction <maximumf>, %42, %cst_16 [1] : vector<1x16xf32> to vector<1xf32>
    %44 = vector.shape_cast %43 : vector<1xf32> to vector<1x1xf32>
    %cst_17 = arith.constant 0.000000e+00 : f32
    %45 = vector.shape_cast %44 : vector<1x1xf32> to vector<1x1xf32>
    %46 = vector.broadcast %45 : vector<1x1xf32> to vector<1x16xf32>
    %47 = vector.broadcast %cst_17 : f32 to vector<1x16xf32>
    %48 = arith.select %8, %46, %47 : vector<1x16xi1>, vector<1x16xf32>
    %49 = arith.addf %40, %48 : vector<1x16xf32>
    %cst_18 = arith.constant -1.000000e+30 : f32
    %50 = vector.broadcast %cst_18 : f32 to vector<1x16xf32>
    %51 = arith.select %17, %0, %50 : vector<1x16xi1>, vector<1x16xf32>
    %cst_19 = arith.constant dense<0xFF800000> : vector<1xf32>
    %52 = vector.multi_reduction <maximumf>, %51, %cst_19 [1] : vector<1x16xf32> to vector<1xf32>
    %53 = vector.shape_cast %52 : vector<1xf32> to vector<1x1xf32>
    %cst_20 = arith.constant 0.000000e+00 : f32
    %54 = vector.shape_cast %53 : vector<1x1xf32> to vector<1x1xf32>
    %55 = vector.broadcast %54 : vector<1x1xf32> to vector<1x16xf32>
    %56 = vector.broadcast %cst_20 : f32 to vector<1x16xf32>
    %57 = arith.select %17, %55, %56 : vector<1x16xi1>, vector<1x16xf32>
    %58 = arith.addf %49, %57 : vector<1x16xf32>
    %cst_21 = arith.constant -1.000000e+30 : f32
    %59 = vector.broadcast %cst_21 : f32 to vector<1x16xf32>
    %60 = arith.select %26, %0, %59 : vector<1x16xi1>, vector<1x16xf32>
    %cst_22 = arith.constant dense<0xFF800000> : vector<1xf32>
    %61 = vector.multi_reduction <maximumf>, %60, %cst_22 [1] : vector<1x16xf32> to vector<1xf32>
    %62 = vector.shape_cast %61 : vector<1xf32> to vector<1x1xf32>
    %cst_23 = arith.constant 0.000000e+00 : f32
    %63 = vector.shape_cast %62 : vector<1x1xf32> to vector<1x1xf32>
    %64 = vector.broadcast %63 : vector<1x1xf32> to vector<1x16xf32>
    %65 = vector.broadcast %cst_23 : f32 to vector<1x16xf32>
    %66 = arith.select %26, %64, %65 : vector<1x16xi1>, vector<1x16xf32>
    %67 = arith.addf %58, %66 : vector<1x16xf32>
    %cst_24 = arith.constant -1.000000e+30 : f32
    %68 = vector.broadcast %cst_24 : f32 to vector<1x16xf32>
    %69 = arith.select %35, %0, %68 : vector<1x16xi1>, vector<1x16xf32>
    %cst_25 = arith.constant dense<0xFF800000> : vector<1xf32>
    %70 = vector.multi_reduction <maximumf>, %69, %cst_25 [1] : vector<1x16xf32> to vector<1xf32>
    %71 = vector.shape_cast %70 : vector<1xf32> to vector<1x1xf32>
    %cst_26 = arith.constant 0.000000e+00 : f32
    %72 = vector.shape_cast %71 : vector<1x1xf32> to vector<1x1xf32>
    %73 = vector.broadcast %72 : vector<1x1xf32> to vector<1x16xf32>
    %74 = vector.broadcast %cst_26 : f32 to vector<1x16xf32>
    %75 = arith.select %35, %73, %74 : vector<1x16xi1>, vector<1x16xf32>
    %76 = arith.addf %67, %75 : vector<1x16xf32>
    %77 = arith.subf %0, %76 : vector<1x16xf32>
    %78 = math.exp %77 : vector<1x16xf32>
    %cst_27 = arith.constant 0.000000e+00 : f32
    %79 = vector.broadcast %cst_27 : f32 to vector<1x16xf32>
    %cst_28 = arith.constant 0.000000e+00 : f32
    %80 = vector.broadcast %cst_28 : f32 to vector<1x16xf32>
    %81 = arith.select %8, %78, %80 : vector<1x16xi1>, vector<1x16xf32>
    %cst_29 = arith.constant dense<0.000000e+00> : vector<1xf32>
    %82 = vector.multi_reduction <add>, %81, %cst_29 [1] : vector<1x16xf32> to vector<1xf32>
    %83 = vector.shape_cast %82 : vector<1xf32> to vector<1x1xf32>
    %cst_30 = arith.constant 0.000000e+00 : f32
    %84 = vector.shape_cast %83 : vector<1x1xf32> to vector<1x1xf32>
    %85 = vector.broadcast %84 : vector<1x1xf32> to vector<1x16xf32>
    %86 = vector.broadcast %cst_30 : f32 to vector<1x16xf32>
    %87 = arith.select %8, %85, %86 : vector<1x16xi1>, vector<1x16xf32>
    %88 = arith.addf %79, %87 : vector<1x16xf32>
    %cst_31 = arith.constant 0.000000e+00 : f32
    %89 = vector.broadcast %cst_31 : f32 to vector<1x16xf32>
    %90 = arith.select %17, %78, %89 : vector<1x16xi1>, vector<1x16xf32>
    %cst_32 = arith.constant dense<0.000000e+00> : vector<1xf32>
    %91 = vector.multi_reduction <add>, %90, %cst_32 [1] : vector<1x16xf32> to vector<1xf32>
    %92 = vector.shape_cast %91 : vector<1xf32> to vector<1x1xf32>
    %cst_33 = arith.constant 0.000000e+00 : f32
    %93 = vector.shape_cast %92 : vector<1x1xf32> to vector<1x1xf32>
    %94 = vector.broadcast %93 : vector<1x1xf32> to vector<1x16xf32>
    %95 = vector.broadcast %cst_33 : f32 to vector<1x16xf32>
    %96 = arith.select %17, %94, %95 : vector<1x16xi1>, vector<1x16xf32>
    %97 = arith.addf %88, %96 : vector<1x16xf32>
    %cst_34 = arith.constant 0.000000e+00 : f32
    %98 = vector.broadcast %cst_34 : f32 to vector<1x16xf32>
    %99 = arith.select %26, %78, %98 : vector<1x16xi1>, vector<1x16xf32>
    %cst_35 = arith.constant dense<0.000000e+00> : vector<1xf32>
    %100 = vector.multi_reduction <add>, %99, %cst_35 [1] : vector<1x16xf32> to vector<1xf32>
    %101 = vector.shape_cast %100 : vector<1xf32> to vector<1x1xf32>
    %cst_36 = arith.constant 0.000000e+00 : f32
    %102 = vector.shape_cast %101 : vector<1x1xf32> to vector<1x1xf32>
    %103 = vector.broadcast %102 : vector<1x1xf32> to vector<1x16xf32>
    %104 = vector.broadcast %cst_36 : f32 to vector<1x16xf32>
    %105 = arith.select %26, %103, %104 : vector<1x16xi1>, vector<1x16xf32>
    %106 = arith.addf %97, %105 : vector<1x16xf32>
    %cst_37 = arith.constant 0.000000e+00 : f32
    %107 = vector.broadcast %cst_37 : f32 to vector<1x16xf32>
    %108 = arith.select %35, %78, %107 : vector<1x16xi1>, vector<1x16xf32>
    %cst_38 = arith.constant dense<0.000000e+00> : vector<1xf32>
    %109 = vector.multi_reduction <add>, %108, %cst_38 [1] : vector<1x16xf32> to vector<1xf32>
    %110 = vector.shape_cast %109 : vector<1xf32> to vector<1x1xf32>
    %cst_39 = arith.constant 0.000000e+00 : f32
    %111 = vector.shape_cast %110 : vector<1x1xf32> to vector<1x1xf32>
    %112 = vector.broadcast %111 : vector<1x1xf32> to vector<1x16xf32>
    %113 = vector.broadcast %cst_39 : f32 to vector<1x16xf32>
    %114 = arith.select %35, %112, %113 : vector<1x16xi1>, vector<1x16xf32>
    %115 = arith.addf %106, %114 : vector<1x16xf32>
    %116 = math.log %115 : vector<1x16xf32>
    %117 = arith.subf %77, %116 : vector<1x16xf32>
    %cst_40 = arith.constant 0.000000e+00 : f32
    %118 = vector.broadcast %cst_40 : f32 to vector<8x16xf32>
    %cst_41 = arith.constant -1.000000e+30 : f32
    %119 = vector.shape_cast %8 : vector<1x16xi1> to vector<1x16xi1>
    %120 = vector.broadcast %119 : vector<1x16xi1> to vector<8x16xi1>
    %121 = vector.broadcast %cst_41 : f32 to vector<8x16xf32>
    %122 = arith.select %120, %1, %121 : vector<8x16xi1>, vector<8x16xf32>
    %cst_42 = arith.constant dense<0xFF800000> : vector<8xf32>
    %123 = vector.multi_reduction <maximumf>, %122, %cst_42 [1] : vector<8x16xf32> to vector<8xf32>
    %124 = vector.shape_cast %123 : vector<8xf32> to vector<8x1xf32>
    %cst_43 = arith.constant 0.000000e+00 : f32
    %125 = vector.shape_cast %8 : vector<1x16xi1> to vector<1x16xi1>
    %126 = vector.broadcast %125 : vector<1x16xi1> to vector<8x16xi1>
    %127 = vector.shape_cast %124 : vector<8x1xf32> to vector<8x1xf32>
    %128 = vector.broadcast %127 : vector<8x1xf32> to vector<8x16xf32>
    %129 = vector.broadcast %cst_43 : f32 to vector<8x16xf32>
    %130 = arith.select %126, %128, %129 : vector<8x16xi1>, vector<8x16xf32>
    %131 = arith.addf %118, %130 : vector<8x16xf32>
    %cst_44 = arith.constant -1.000000e+30 : f32
    %132 = vector.shape_cast %17 : vector<1x16xi1> to vector<1x16xi1>
    %133 = vector.broadcast %132 : vector<1x16xi1> to vector<8x16xi1>
    %134 = vector.broadcast %cst_44 : f32 to vector<8x16xf32>
    %135 = arith.select %133, %1, %134 : vector<8x16xi1>, vector<8x16xf32>
    %cst_45 = arith.constant dense<0xFF800000> : vector<8xf32>
    %136 = vector.multi_reduction <maximumf>, %135, %cst_45 [1] : vector<8x16xf32> to vector<8xf32>
    %137 = vector.shape_cast %136 : vector<8xf32> to vector<8x1xf32>
    %cst_46 = arith.constant 0.000000e+00 : f32
    %138 = vector.shape_cast %17 : vector<1x16xi1> to vector<1x16xi1>
    %139 = vector.broadcast %138 : vector<1x16xi1> to vector<8x16xi1>
    %140 = vector.shape_cast %137 : vector<8x1xf32> to vector<8x1xf32>
    %141 = vector.broadcast %140 : vector<8x1xf32> to vector<8x16xf32>
    %142 = vector.broadcast %cst_46 : f32 to vector<8x16xf32>
    %143 = arith.select %139, %141, %142 : vector<8x16xi1>, vector<8x16xf32>
    %144 = arith.addf %131, %143 : vector<8x16xf32>
    %cst_47 = arith.constant -1.000000e+30 : f32
    %145 = vector.shape_cast %26 : vector<1x16xi1> to vector<1x16xi1>
    %146 = vector.broadcast %145 : vector<1x16xi1> to vector<8x16xi1>
    %147 = vector.broadcast %cst_47 : f32 to vector<8x16xf32>
    %148 = arith.select %146, %1, %147 : vector<8x16xi1>, vector<8x16xf32>
    %cst_48 = arith.constant dense<0xFF800000> : vector<8xf32>
    %149 = vector.multi_reduction <maximumf>, %148, %cst_48 [1] : vector<8x16xf32> to vector<8xf32>
    %150 = vector.shape_cast %149 : vector<8xf32> to vector<8x1xf32>
    %cst_49 = arith.constant 0.000000e+00 : f32
    %151 = vector.shape_cast %26 : vector<1x16xi1> to vector<1x16xi1>
    %152 = vector.broadcast %151 : vector<1x16xi1> to vector<8x16xi1>
    %153 = vector.shape_cast %150 : vector<8x1xf32> to vector<8x1xf32>
    %154 = vector.broadcast %153 : vector<8x1xf32> to vector<8x16xf32>
    %155 = vector.broadcast %cst_49 : f32 to vector<8x16xf32>
    %156 = arith.select %152, %154, %155 : vector<8x16xi1>, vector<8x16xf32>
    %157 = arith.addf %144, %156 : vector<8x16xf32>
    %cst_50 = arith.constant -1.000000e+30 : f32
    %158 = vector.shape_cast %35 : vector<1x16xi1> to vector<1x16xi1>
    %159 = vector.broadcast %158 : vector<1x16xi1> to vector<8x16xi1>
    %160 = vector.broadcast %cst_50 : f32 to vector<8x16xf32>
    %161 = arith.select %159, %1, %160 : vector<8x16xi1>, vector<8x16xf32>
    %cst_51 = arith.constant dense<0xFF800000> : vector<8xf32>
    %162 = vector.multi_reduction <maximumf>, %161, %cst_51 [1] : vector<8x16xf32> to vector<8xf32>
    %163 = vector.shape_cast %162 : vector<8xf32> to vector<8x1xf32>
    %cst_52 = arith.constant 0.000000e+00 : f32
    %164 = vector.shape_cast %35 : vector<1x16xi1> to vector<1x16xi1>
    %165 = vector.broadcast %164 : vector<1x16xi1> to vector<8x16xi1>
    %166 = vector.shape_cast %163 : vector<8x1xf32> to vector<8x1xf32>
    %167 = vector.broadcast %166 : vector<8x1xf32> to vector<8x16xf32>
    %168 = vector.broadcast %cst_52 : f32 to vector<8x16xf32>
    %169 = arith.select %165, %167, %168 : vector<8x16xi1>, vector<8x16xf32>
    %170 = arith.addf %157, %169 : vector<8x16xf32>
    %171 = arith.subf %1, %170 : vector<8x16xf32>
    %172 = math.exp %171 : vector<8x16xf32>
    %cst_53 = arith.constant 0.000000e+00 : f32
    %173 = vector.broadcast %cst_53 : f32 to vector<8x16xf32>
    %cst_54 = arith.constant 0.000000e+00 : f32
    %174 = vector.shape_cast %8 : vector<1x16xi1> to vector<1x16xi1>
    %175 = vector.broadcast %174 : vector<1x16xi1> to vector<8x16xi1>
    %176 = vector.broadcast %cst_54 : f32 to vector<8x16xf32>
    %177 = arith.select %175, %172, %176 : vector<8x16xi1>, vector<8x16xf32>
    %cst_55 = arith.constant dense<0.000000e+00> : vector<8xf32>
    %178 = vector.multi_reduction <add>, %177, %cst_55 [1] : vector<8x16xf32> to vector<8xf32>
    %179 = vector.shape_cast %178 : vector<8xf32> to vector<8x1xf32>
    %cst_56 = arith.constant 0.000000e+00 : f32
    %180 = vector.shape_cast %8 : vector<1x16xi1> to vector<1x16xi1>
    %181 = vector.broadcast %180 : vector<1x16xi1> to vector<8x16xi1>
    %182 = vector.shape_cast %179 : vector<8x1xf32> to vector<8x1xf32>
    %183 = vector.broadcast %182 : vector<8x1xf32> to vector<8x16xf32>
    %184 = vector.broadcast %cst_56 : f32 to vector<8x16xf32>
    %185 = arith.select %181, %183, %184 : vector<8x16xi1>, vector<8x16xf32>
    %186 = arith.addf %173, %185 : vector<8x16xf32>
    %cst_57 = arith.constant 0.000000e+00 : f32
    %187 = vector.shape_cast %17 : vector<1x16xi1> to vector<1x16xi1>
    %188 = vector.broadcast %187 : vector<1x16xi1> to vector<8x16xi1>
    %189 = vector.broadcast %cst_57 : f32 to vector<8x16xf32>
    %190 = arith.select %188, %172, %189 : vector<8x16xi1>, vector<8x16xf32>
    %cst_58 = arith.constant dense<0.000000e+00> : vector<8xf32>
    %191 = vector.multi_reduction <add>, %190, %cst_58 [1] : vector<8x16xf32> to vector<8xf32>
    %192 = vector.shape_cast %191 : vector<8xf32> to vector<8x1xf32>
    %cst_59 = arith.constant 0.000000e+00 : f32
    %193 = vector.shape_cast %17 : vector<1x16xi1> to vector<1x16xi1>
    %194 = vector.broadcast %193 : vector<1x16xi1> to vector<8x16xi1>
    %195 = vector.shape_cast %192 : vector<8x1xf32> to vector<8x1xf32>
    %196 = vector.broadcast %195 : vector<8x1xf32> to vector<8x16xf32>
    %197 = vector.broadcast %cst_59 : f32 to vector<8x16xf32>
    %198 = arith.select %194, %196, %197 : vector<8x16xi1>, vector<8x16xf32>
    %199 = arith.addf %186, %198 : vector<8x16xf32>
    %cst_60 = arith.constant 0.000000e+00 : f32
    %200 = vector.shape_cast %26 : vector<1x16xi1> to vector<1x16xi1>
    %201 = vector.broadcast %200 : vector<1x16xi1> to vector<8x16xi1>
    %202 = vector.broadcast %cst_60 : f32 to vector<8x16xf32>
    %203 = arith.select %201, %172, %202 : vector<8x16xi1>, vector<8x16xf32>
    %cst_61 = arith.constant dense<0.000000e+00> : vector<8xf32>
    %204 = vector.multi_reduction <add>, %203, %cst_61 [1] : vector<8x16xf32> to vector<8xf32>
    %205 = vector.shape_cast %204 : vector<8xf32> to vector<8x1xf32>
    %cst_62 = arith.constant 0.000000e+00 : f32
    %206 = vector.shape_cast %26 : vector<1x16xi1> to vector<1x16xi1>
    %207 = vector.broadcast %206 : vector<1x16xi1> to vector<8x16xi1>
    %208 = vector.shape_cast %205 : vector<8x1xf32> to vector<8x1xf32>
    %209 = vector.broadcast %208 : vector<8x1xf32> to vector<8x16xf32>
    %210 = vector.broadcast %cst_62 : f32 to vector<8x16xf32>
    %211 = arith.select %207, %209, %210 : vector<8x16xi1>, vector<8x16xf32>
    %212 = arith.addf %199, %211 : vector<8x16xf32>
    %cst_63 = arith.constant 0.000000e+00 : f32
    %213 = vector.shape_cast %35 : vector<1x16xi1> to vector<1x16xi1>
    %214 = vector.broadcast %213 : vector<1x16xi1> to vector<8x16xi1>
    %215 = vector.broadcast %cst_63 : f32 to vector<8x16xf32>
    %216 = arith.select %214, %172, %215 : vector<8x16xi1>, vector<8x16xf32>
    %cst_64 = arith.constant dense<0.000000e+00> : vector<8xf32>
    %217 = vector.multi_reduction <add>, %216, %cst_64 [1] : vector<8x16xf32> to vector<8xf32>
    %218 = vector.shape_cast %217 : vector<8xf32> to vector<8x1xf32>
    %cst_65 = arith.constant 0.000000e+00 : f32
    %219 = vector.shape_cast %35 : vector<1x16xi1> to vector<1x16xi1>
    %220 = vector.broadcast %219 : vector<1x16xi1> to vector<8x16xi1>
    %221 = vector.shape_cast %218 : vector<8x1xf32> to vector<8x1xf32>
    %222 = vector.broadcast %221 : vector<8x1xf32> to vector<8x16xf32>
    %223 = vector.broadcast %cst_65 : f32 to vector<8x16xf32>
    %224 = arith.select %220, %222, %223 : vector<8x16xi1>, vector<8x16xf32>
    %225 = arith.addf %212, %224 : vector<8x16xf32>
    %226 = math.log %225 : vector<8x16xf32>
    %227 = arith.subf %171, %226 : vector<8x16xf32>
    %228 = tpu.reciprocal %225 {approx = true} : vector<8x16xf32> -> vector<8x16xf32>
    %229 = arith.mulf %225, %228 : vector<8x16xf32>
    %cst_66 = arith.constant 2.000000e+00 : f32
    %230 = vector.broadcast %cst_66 : f32 to vector<8x16xf32>
    %231 = arith.subf %230, %229 : vector<8x16xf32>
    %232 = arith.mulf %228, %231 : vector<8x16xf32>
    %233 = arith.mulf %172, %232 : vector<8x16xf32>
    %234 = vector.broadcast %117 : vector<1x16xf32> to vector<8x16xf32>
    %235 = arith.subf %227, %234 : vector<8x16xf32>
    %236 = arith.mulf %233, %235 : vector<8x16xf32>
    %237 = vector.broadcast %39 : vector<1x16xf32> to vector<8x16xf32>
    %238 = arith.mulf %236, %237 : vector<8x16xf32>
    %239 = vector.shape_cast %238 : vector<8x16xf32> to vector<1x8x16xf32>
    %cst_67 = arith.constant dense<0.000000e+00> : vector<1xf32>
    %240 = vector.multi_reduction <add>, %239, %cst_67 [1, 2] : vector<1x8x16xf32> to vector<1xf32>
    %241 = vector.shape_cast %240 : vector<1xf32> to vector<1x1x1xf32>
    %242 = vector.extract %241[0, 0, 0] : f32 from vector<1x1x1xf32>
    %243 = vector.broadcast %242 : f32 to vector<1x1xf32>
    %c0_68 = arith.constant 0 : index
    %c0_69 = arith.constant 0 : index
    %244 = vector.load %arg2[%c0_68, %c0_69] : memref<1x1xf32, #tpu.memory_space<vmem>>, vector<1x1xf32>
    tpu.vector_store %arg2[%c0_68, %c0_69], %243 {strides = array<i32>} : memref<1x1xf32, #tpu.memory_space<vmem>>, vector<1x1xf32>,
    return
  }
}

</mosaic_0001>

<bundles_post_ra>
// kernel: _action_smoothing_loss_jit.1
= control target key start
LH: loop header
LB: loop body
LE: loop exit
PB: predicated region body
PF: predicated region fallthrough
CT: control target
= control target key end

     0   :  { %7 = vsyncpa [#allocation3], 0  ;;  %s443_s0 = inlined_call_operand.vmem [shape: f32[1,16], index: 0, kind: input, shape index: {}]   ;;  %s444_s1 = inlined_call_operand.hbm [shape: f32[8,16], index: 1, kind: input, shape index: {}]   ;;  %s445_s2 = inlined_call_operand.hbm [shape: f32[1,1], index: 2, kind: output, shape index: {}]  }
   0x1   :  { %8 = vsyncpa [#allocation4], 0  ;;  %s271_s9 = smov [#allocation2]   ;;  %s223_s13 = scalar_lea.hbm %s444_s1, 128 }
   0x2   :  { %s17_s10 = sshll.u32 %s271_s9, 4  ;;  %p224_p0 = scmp.ne.s32.totalorder %s444_s1, %s223_s13  ;;  %s18_s10 = int_to_ptr.vmem [resolvable:$true] %s17_s10 }
   0x3   :  { %p227_p1 = scmp.lt.u32.totalorder %s223_s13, %s444_s1 }
   0x5   :  { %p229_p2 = pnand %p227_p1, %p224_p0 }
   0x7   :  { %232 = shalt.err (!%p229_p2)
}
   0x8   :  { %s233_s18 = scalar_lea.vmem %s18_s10, 128  ;;  %p238_p4 = scmp.lt.s32.totalorder %s18_s10, %s18_s10 }
   0x9   :  { %p234_p3 = scmp.ne.s32.totalorder %s18_s10, %s233_s18  ;;  %p239_p5 = scmp.lt.s32.totalorder %s233_s18, %s233_s18 }
   0xb   :  { %p240_p6 = por %p239_p5, %p238_p4 }
   0xd   :  { %p241_p7 = pnand %p240_p6, %p234_p3 }
   0xf   :  { %244 = shalt.err (!%p241_p7)
}
  0x10   :  { %20 = dma.hbm_to_vmem [thread:$0]  %s444_s1, 128, %s18_s10, [#allocation3]  }
  0x11   :  { %267 = dma.done.wait [#allocation3], 128  }
  0x12   :  { %268 = vsyncadd [#allocation3], 4294967168  ;;  %v26_v0 = vlaneseq  ;;  %vm106_vm4 = vcmask 130048   ;;  %vm49_vm5 = vcmask 122880   ;;  %v25_v3 = vld [vmem:[#allocation2] sm:$0xff]  ;;  %vm191_vm12 = vcmask 0  }
  0x13   :  { %v24_v4 = vld [vmem:[%s443_s0] sm:$0x1]  ;;  %s273_s0 = smov [#allocation5]  }
  0x14   :  { %v302_v1 = vand.u32 127, %v26_v0  ;;  %s199_s22 = sshll.u32 %s273_s0, 4  ;;  %s200_s22 = int_to_ptr.vmem [resolvable:$true] %s199_s22 }
  0x15   :  { %s245_s24 = scalar_lea.vmem %s200_s22, 16  ;;  %s249_s25 = scalar_lea.vmem %s200_s22, 32 }
  0x16   :  { %vm33_vm0 = vcmp.ge.s32.totalorder %v302_v1, 4  ;;  %vm34_vm1 = vcmp.lt.s32.totalorder %v302_v1, 10  ;;  %vm29_vm2 = vcmp.lt.s32.totalorder %v302_v1, 4  ;;  %vm38_vm6 = vcmp.ge.s32.totalorder %v302_v1, 10  ;;  %p246_p8 = scmp.ne.s32.totalorder %s200_s22, %s245_s24  ;;  %p250_p9 = scmp.lt.s32.totalorder %s200_s22, %s200_s22 }
  0x17   :  { %vm307_vm3 = vmand %vm33_vm0, %vm34_vm1  ;;  %vm39_vm7 = vcmp.lt.s32.totalorder %v302_v1, 12  ;;  %v105_v5 = vsel %vm29_vm2, %v25_v3, -1e+30  ;;  %v48_v6 = vsel %vm29_vm2, %v24_v4, -1e+30  ;;  %vm43_vm9 = vcmp.ge.s32.totalorder %v302_v1, 12  ;;  %p251_p10 = scmp.lt.s32.totalorder %s249_s25, %s245_s24 }
  0x18   :  { %v114_v7 = vsel %vm307_vm3, %v25_v3, -1e+30  ;;  %v107_v8 = vsel %vm106_vm4, %v105_v5, -inf  ;;  %v50_v9 = vsel %vm49_vm5, %v48_v6, -inf  ;;  %v55_v10 = vsel %vm307_vm3, %v24_v4, -1e+30  ;;  %vm326_vm8 = vmand %vm38_vm6, %vm39_vm7 }
  0x19   :  { %108 = vmax.xlane.f32.xlu1 %v107_v8  ;;  %51 = vmax.xlane.f32.xlu0 %v50_v9  ;;  %vm44_vm10 = vcmp.lt.s32.totalorder %v302_v1, 16  ;;  %v115_v12 = vsel %vm106_vm4, %v114_v7, -inf  ;;  %v56_v13 = vsel %vm49_vm5, %v55_v10, -inf  ;;  %v122_v14 = vsel %vm326_vm8, %v25_v3, -1e+30  ;;  %p252_p11 = por %p251_p10, %p250_p9 }
  0x1a   :  { %v61_v15 = vsel %vm326_vm8, %v24_v4, -1e+30  ;;  %vm338_vm11 = vmand %vm43_vm9, %vm44_vm10  ;;  %v123_v17 = vsel %vm106_vm4, %v122_v14, -inf }
  0x1b   :  { %v62_v18 = vsel %vm49_vm5, %v61_v15, -inf  ;;  %v130_v19 = vsel %vm338_vm11, %v25_v3, -1e+30  ;;  %v67_v20 = vsel %vm338_vm11, %v24_v4, -1e+30  ;;  %p253_p12 = pnand %p252_p11, %p246_p8 }
  0x1c   :  { %v131_v21 = vsel %vm106_vm4, %v130_v19, -inf  ;;  %v68_v22 = vsel %vm49_vm5, %v67_v20, -inf }
  0x1d   :  { %116 = vmax.xlane.f32.xlu1 %v115_v12  ;;  %57 = vmax.xlane.f32.xlu0 %v56_v13 }
  0x21   :  { %124 = vmax.xlane.f32.xlu1 %v123_v17  ;;  %63 = vmax.xlane.f32.xlu0 %v62_v18 }
  0x25   :  { %132 = vmax.xlane.f32.xlu1 %v131_v21  ;;  %69 = vmax.xlane.f32.xlu0 %v68_v22 }
  0xa6   :  { %v109_v23 = vpop.xlane.xlu1 %108  ;;  %v52_v24 = vpop.xlane.xlu0 %51 }
  0xa7   :  { %v110_v27 = vsel %vm29_vm2, %v109_v23, 0.0  ;;  %v53_v32 = vsel %vm29_vm2, %v52_v24, 0.0 }
  0xaa   :  { %v117_v25 = vpop.xlane.xlu1 %116  ;;  %v58_v26 = vpop.xlane.xlu0 %57 }
  0xab   :  { %v118_v28 = vsel %vm307_vm3, %v117_v25, 0.0  ;;  %v59_v29 = vsel %vm307_vm3, %v58_v26, 0.0 }
  0xac   :  { %v119_v35 = vadd.f32 %v118_v28, %v110_v27  ;;  %v60_v36 = vadd.f32 %v59_v29, %v53_v32 }
  0xae   :  { %v125_v30 = vpop.xlane.xlu1 %124  ;;  %v64_v31 = vpop.xlane.xlu0 %63 }
  0xaf   :  { %v126_v33 = vsel %vm326_vm8, %v125_v30, 0.0  ;;  %v65_v34 = vsel %vm326_vm8, %v64_v31, 0.0  ;;  %v272_v30 = vmov 0.0  }
  0xb0   :  { %v127_v37 = vadd.f32 %v126_v33, %v119_v35  ;;  %v66_v38 = vadd.f32 %v65_v34, %v60_v36  ;;  %v31_v31 = vsel %vm29_vm2, 0.03125, %v272_v30  ;;  %v36_v32 = vsel %vm307_vm3, 0.020833334, %v272_v30 }
  0xb1   :  { %v173_v33 = vshrl.u32 %v26_v0, 7  ;;  %v37_v36 = vadd.f32 %v36_v32, %v31_v31  ;;  %v46_v2 = vsel %vm338_vm11, 0.03125, %v272_v30 }
  0xb2   :  { %v133_v39 = vpop.xlane.xlu1 %132  ;;  %v70_v40 = vpop.xlane.xlu0 %69 }
  0xb3   :  { %v134_v41 = vsel %vm338_vm11, %v133_v39, 0.0  ;;  %v71_v42 = vsel %vm338_vm11, %v70_v40, 0.0  ;;  %v41_v39 = vsel %vm326_vm8, 0.0625, %v272_v30 }
  0xb4   :  { %v135_v43 = vadd.f32 %v134_v41, %v127_v37  ;;  %v72_v44 = vadd.f32 %v71_v42, %v66_v38  ;;  %v174_v42 = vsub.s32 0, %v173_v33 }
  0xb6   :  { %v366_v45 = vsub.f32 %v25_v3, %v135_v43  ;;  %v368_v46 = vsub.f32 %v24_v4, %v72_v44  ;;  %v42_v44 = vadd.f32 %v41_v39, %v37_v36 }
  0xb8   :  { %v137_v47 = vmul.f32 1.442695, %v366_v45  ;;  %v74_v48 = vmul.f32 1.442695, %v368_v46 }
  0xba   :  { %213 = vpow2.f32 %v137_v47 }
  0xbb   :  { %215 = vpow2.f32 %v74_v48 }
  0xc4   :  { %v372_v49 = vpop.eup %213 }
  0xc5   :  { %v216_v50 = vpop.eup %215  ;;  %v145_v55 = vsel %vm307_vm3, %v372_v49, 0.0  ;;  %v139_v56 = vsel %vm29_vm2, %v372_v49, 0.0  ;;  %v151_v59 = vsel %vm326_vm8, %v372_v49, 0.0  ;;  %v157_v63 = vsel %vm338_vm11, %v372_v49, 0.0 }
  0xc6   :  { %v82_v51 = vsel %vm307_vm3, %v216_v50, 0.0  ;;  %v76_v52 = vsel %vm29_vm2, %v216_v50, 0.0  ;;  %v146_v57 = vsel %vm106_vm4, %v145_v55, 0.0  ;;  %v140_v58 = vsel %vm106_vm4, %v139_v56, 0.0 }
  0xc7   :  { %v83_v53 = vsel %vm49_vm5, %v82_v51, 0.0  ;;  %v77_v54 = vsel %vm49_vm5, %v76_v52, 0.0  ;;  %v88_v60 = vsel %vm326_vm8, %v216_v50, 0.0  ;;  %v152_v61 = vsel %vm106_vm4, %v151_v59, 0.0 }
  0xc8   :  { %84 = vadd.xlane.f32.xlu1 %v83_v53  ;;  %78 = vadd.xlane.f32.xlu0 %v77_v54  ;;  %v89_v62 = vsel %vm49_vm5, %v88_v60, 0.0  ;;  %v94_v3 = vsel %vm338_vm11, %v216_v50, 0.0  ;;  %v158_v4 = vsel %vm106_vm4, %v157_v63, 0.0  ;;  %v47_v51 = vadd.f32 %v46_v2, %v42_v44 }
  0xc9   :  { %v95_v5 = vsel %vm49_vm5, %v94_v3, 0.0 }
  0xcc   :  { %147 = vadd.xlane.f32.xlu1 %v146_v57  ;;  %141 = vadd.xlane.f32.xlu0 %v140_v58 }
  0xd0   :  { %153 = vadd.xlane.f32.xlu1 %v152_v61  ;;  %90 = vadd.xlane.f32.xlu0 %v89_v62 }
  0xd4   :  { %159 = vadd.xlane.f32.xlu1 %v158_v4  ;;  %96 = vadd.xlane.f32.xlu0 %v95_v5 }
 0x155   :  { %v85_v6 = vpop.xlane.xlu1 %84  ;;  %v79_v7 = vpop.xlane.xlu0 %78 }
 0x156   :  { %v86_v10 = vsel %vm307_vm3, %v85_v6, 0.0  ;;  %v80_v12 = vsel %vm29_vm2, %v79_v7, 0.0 }
 0x157   :  { %v87_v20 = vadd.f32 %v86_v10, %v80_v12 }
 0x159   :  { %v148_v8 = vpop.xlane.xlu1 %147  ;;  %v142_v9 = vpop.xlane.xlu0 %141 }
 0x15a   :  { %v149_v13 = vsel %vm307_vm3, %v148_v8, 0.0  ;;  %v143_v14 = vsel %vm29_vm2, %v142_v9, 0.0 }
 0x15b   :  { %v150_v21 = vadd.f32 %v149_v13, %v143_v14 }
 0x15d   :  { %v154_v15 = vpop.xlane.xlu1 %153  ;;  %v91_v17 = vpop.xlane.xlu0 %90 }
 0x15e   :  { %v155_v18 = vsel %vm326_vm8, %v154_v15, 0.0  ;;  %v92_v19 = vsel %vm326_vm8, %v91_v17, 0.0 }
 0x15f   :  { %v156_v22 = vadd.f32 %v155_v18, %v150_v21  ;;  %v93_v23 = vadd.f32 %v92_v19, %v87_v20 }
 0x161   :  { %v160_v24 = vpop.xlane.xlu1 %159  ;;  %v97_v25 = vpop.xlane.xlu0 %96 }
 0x162   :  { %v161_v26 = vsel %vm338_vm11, %v160_v24, 0.0  ;;  %v98_v27 = vsel %vm338_vm11, %v97_v25, 0.0 }
 0x163   :  { %v162_v28 = vadd.f32 %v161_v26, %v156_v22  ;;  %v99_v29 = vadd.f32 %v98_v27, %v93_v23 }
 0x165   :  { %217 = vlog2.f32 %v162_v28 }
 0x166   :  { %219 = vrcp.f32 %v162_v28 }
 0x167   :  { %221 = vlog2.f32 %v99_v29 }
 0x16f   :  { %v218_v34 = vpop.eup %217 }
 0x170   :  { %v220_v35 = vpop.eup %219  ;;  %v164_v40 = vmul.f32 0.6931472, %v218_v34 }
 0x171   :  { %v222_v37 = vpop.eup %221  ;;  %v167_v38 = vmul.f32 %v220_v35, %v162_v28 }
 0x172   :  { %v101_v41 = vmul.f32 0.6931472, %v222_v37  ;;  %v165_v0 = vsub.f32 %v366_v45, %v164_v40 }
 0x173   :  { %v168_v43 = vsub.f32 2.0, %v167_v38 }
 0x174   :  { %v102_v1 = vsub.f32 %v368_v46, %v101_v41 }
 0x175   :  { %v169_v47 = vmul.f32 %v220_v35, %v168_v43 }
 0x176   :  { %v175_v48 = vrot.slane %v102_v1, %v174_v42 }
 0x177   :  { %v170_v50 = vmul.f32 %v372_v49, %v169_v47 }
 0x178   :  { %v177_v52 = vsub.f32 %v165_v0, %v175_v48 }
 0x17a   :  { %v178_v11 = vmul.f32 %v177_v52, %v170_v50 }
 0x17c   :  { %v179_v53 = vmul.f32 %v178_v11, %v47_v51 }
 0x17e   :  { %v180_v54 = vsel %vm106_vm4, %v179_v53, 0.0 }
 0x17f   :  { %181 = vadd.xlane.f32.xlu0 %v180_v54 }
 0x20c   :  { %v182_v55 = vpop.xlane.xlu0 %181 }
 0x20d   :  { %v183_v56 = vrot.slane %v182_v55, 4 }
 0x20f   :  { %v184_v46 = vadd.f32 %v183_v56, %v182_v55 }
 0x211   :  { %v185_v57 = vrot.slane %v184_v46, 2 }
 0x213   :  { %v186_v58 = vadd.f32 %v185_v57, %v184_v46 }
 0x215   :  { %v187_v16 = vrot.slane %v186_v58, 1 }
 0x217   :  { %v188_v59 = vadd.f32 %v187_v16, %v186_v58 }
 0x219   :  { %208 = vpush %v188_v59 }
 0x24a   :  { %s209_s23 = spop %208 }
 0x24b   :  { %v190_v45 = vstv %s209_s23 }
 0x24c   :  { %192 = vst.msk [vmem:[#allocation5] sm:$0x1] %vm191_vm12, %v190_v45 }
 0x24d   :  { %256 = shalt.err (!%p253_p12)
}
 0x24e   :  { %s257_s28 = scalar_lea.hbm %s445_s2, 16 }
 0x24f   :  { %p258_p13 = scmp.ne.s32.totalorder %s445_s2, %s257_s28  ;;  %p261_p0 = scmp.lt.u32.totalorder %s257_s28, %s445_s2 }
 0x251   :  { %p263_p1 = pnand %p261_p0, %p258_p13 }
 0x253   :  { %266 = shalt.err (!%p263_p1)
}
 0x254   :  { %202 = dma.vmem_to_hbm [thread:$0]  %s200_s22, 16, %s445_s2, [#allocation4]  }
 0x255   :  { %269 = dma.done.wait [#allocation4], 16  }
 0x256   :  { %270 = vsyncadd [#allocation4], 4294967280 }
 0x257   :  { %206 = vsyncpa [#allocation3], 1 }
 0x258   :  { %207 = vsyncpa [#allocation4], 1 }

</bundles_post_ra>
